<compile_context>
chip_gen: v7x
topology: tpu7x:2x2x1
jax: 0.10.0
libtpu: 0.0.40
codegen_flags: <defaults>
</compile_context>

<pallas_src>
import jax
import jax.numpy as jnp
from jax.experimental import pallas as pl
from jax.experimental.pallas import tpu as pltpu


# ----------------------------- in-kernel helpers -----------------------------

def _lstm_step(xh, c, w_ref, b_ref):
    """Fused LSTM cell.

    xh : [B, E+H] f32   (concatenated [x | h])
    c  : [B, H]   f32
    w  : [E+H, 4H] bf16 (pre-concatenated [Wih; Whh]) -> single MXU push
    b  : [1, 4H]  f32
    PyTorch gate order (i, f, g, o).
    """
    gates = (jnp.dot(xh.astype(jnp.bfloat16), w_ref[...],
                     preferred_element_type=jnp.float32) + b_ref[...])
    H = c.shape[-1]
    i = jax.nn.sigmoid(gates[:, 0 * H:1 * H])
    f = jax.nn.sigmoid(gates[:, 1 * H:2 * H])
    g = jnp.tanh(gates[:, 2 * H:3 * H])
    o = jax.nn.sigmoid(gates[:, 3 * H:4 * H])
    c_new = f * c + i * g
    h_new = o * jnp.tanh(c_new)
    return h_new, c_new


# ----------------------------- fused kernel -----------------------------

def seq2seq_kernel(tf_ref,                               # SMEM [steps] int32
                   src_emb_ref,                          # VMEM [T, B, E] f32
                   x0_ref,                               # VMEM [B, E]    f32
                   tgt_emb_ref,                          # VMEM [steps, B, E] f32
                   enc_w_ref, enc_b_ref,                 # bf16 [E+H,4H], f32 [1,4H]
                   dec_w_ref, dec_b_ref,                 # bf16 [E+H,4H], f32 [1,4H]
                   wfc_ref, bfc_ref,                     # bf16 [H,V],    f32 [1,V]
                   emb_ref,                              # bf16 [V, E] (dec emb table)
                   out_ref,                              # f32  [tgt_len, B, V]
                   xh_sc, c_sc):                         # VMEM scratch carries
    T = src_emb_ref.shape[0]
    steps = tgt_emb_ref.shape[0]
    E = x0_ref.shape[-1]
    B, V = out_ref.shape[1], out_ref.shape[2]

    # ---------------- encoder: h/c start at zero, carried in VMEM ----------------
    xh_sc[...] = jnp.zeros_like(xh_sc)
    c_sc[...] = jnp.zeros_like(c_sc)

    @pl.loop(0, T)
    def _(t):
        xh_sc[:, 0:E] = src_emb_ref[t]
        h_new, c_new = _lstm_step(xh_sc[...], c_sc[...], enc_w_ref, enc_b_ref)
        xh_sc[:, E:] = h_new
        c_sc[...] = c_new

    # ---------------- decoder ----------------
    out_ref[0] = jnp.zeros((B, V), jnp.float32)        # outputs[0] stays zero
    xh_sc[:, 0:E] = x0_ref[...]                        # x = embedding(target[0])

    # lane iota for argmax tie-breaking, hoisted out of the per-step loop
    lane = jax.lax.broadcasted_iota(jnp.int32, (B, V), 1)

    @pl.loop(0, steps)
    def _(i):
        h_new, c_new = _lstm_step(xh_sc[...], c_sc[...], dec_w_ref, dec_b_ref)
        xh_sc[:, E:] = h_new
        c_sc[...] = c_new

        logits = (jnp.dot(h_new.astype(jnp.bfloat16), wfc_ref[...],
                          preferred_element_type=jnp.float32) + bfc_ref[...])
        out_ref[i + 1] = logits                        # lane-dense [B, V] store

        # Next decoder input; skipped entirely on the last step (dead work).
        @pl.when(i < steps - 1)
        def _():
            tf = tf_ref[i]                             # scalar from SMEM

            @pl.when(tf != 0)
            def _():                                   # teacher forced
                xh_sc[:, 0:E] = tgt_emb_ref[i]

            @pl.when(tf == 0)
            def _():                                   # greedy decode
                # argmax with first-index tie-break (== torch.argmax), then the
                # greedy-token embedding via one-hot @ table (fine at V=128).
                # TODO(synk): for a realistic vocab, replace with a row gather
                # and tile the vocab projection over V.
                max_val = jnp.max(logits, axis=-1, keepdims=True)
                cand = jnp.where(logits == max_val, lane, V)
                best = jnp.min(cand, axis=-1, keepdims=True)
                onehot = (lane == best).astype(jnp.bfloat16)
                xh_sc[:, 0:E] = jnp.dot(onehot, emb_ref[...],
                                        preferred_element_type=jnp.float32)


# ----------------------------- wrapper -----------------------------

def seq2seq_forward(params, source, target, key, teacher_force_ratio=0.5):
    """Mirrors PyTorch Seq2Seq.forward (time-major int32 [T, B]); outputs[0]=0."""
    tgt_len, B = target.shape
    E = params["dec_emb"].shape[1]
    H = params["dec_b"].shape[1] // 4
    V = params["dec_wfc"].shape[1]
    steps = tgt_len - 1

    # One-shot glue outside the kernel: embedding gathers + TF coin flips.
    src_emb = params["enc_emb"][source].astype(jnp.float32)       # [T, B, E]
    x0_emb = params["dec_emb"][target[0]].astype(jnp.float32)     # [B, E]
    tgt_emb = params["dec_emb"][target[1:]].astype(jnp.float32)   # [steps, B, E]
    # TODO(synk): stand-in for python `random.random() < ratio` — one flag per
    # step applied to the whole batch, as in the reference loop.
    tf_flags = (jax.random.uniform(key, (steps,))
                < teacher_force_ratio).astype(jnp.int32)

    vmem = pl.BlockSpec(memory_space=pltpu.MemorySpace.VMEM)
    smem = pl.BlockSpec(memory_space=pltpu.MemorySpace.SMEM)

    return pl.pallas_call(
        seq2seq_kernel,
        out_shape=jax.ShapeDtypeStruct((tgt_len, B, V), jnp.float32),
        in_specs=[smem] + [vmem] * 10,
        out_specs=vmem,
        scratch_shapes=[pltpu.VMEM((B, E + H), jnp.float32),      # [x | h] carry
                        pltpu.VMEM((B, H), jnp.float32)],         # c carry
    )(tf_flags, src_emb, x0_emb, tgt_emb,
      params["enc_w"], params["enc_b"],
      params["dec_w"], params["dec_b"],
      params["dec_wfc"], params["dec_bfc"], params["dec_emb"])


# ----------------------------- params (glue) -----------------------------

def init_params(key, src_vocab, tgt_vocab, emb_dim, hidden):
    ks = jax.random.split(key, 10)
    s = 0.1

    def n(k, shape):
        return s * jax.random.normal(k, shape, jnp.float32)

    return {
        # encoder: gate weights pre-concatenated [Wih; Whh] -> (E+H, 4H), bf16
        "enc_emb": n(ks[0], (src_vocab, emb_dim)).astype(jnp.bfloat16),
        "enc_w":   jnp.concatenate([n(ks[1], (emb_dim, 4 * hidden)),
                                    n(ks[2], (hidden, 4 * hidden))],
                                   axis=0).astype(jnp.bfloat16),
        "enc_b":   n(ks[3], (1, 4 * hidden)),
        # decoder
        "dec_emb": n(ks[4], (tgt_vocab, emb_dim)).astype(jnp.bfloat16),
        "dec_w":   jnp.concatenate([n(ks[5], (emb_dim, 4 * hidden)),
                                    n(ks[6], (hidden, 4 * hidden))],
                                   axis=0).astype(jnp.bfloat16),
        "dec_b":   n(ks[7], (1, 4 * hidden)),
        "dec_wfc": n(ks[8], (hidden, tgt_vocab)).astype(jnp.bfloat16),
        "dec_bfc": n(ks[9], (1, tgt_vocab)),
    }


# ----------------------------- main -----------------------------

if __name__ == "__main__":
    # H, E, V chosen as multiples of 128 so gate slices / logits are lane-aligned.
    SRC_VOCAB = 64
    TGT_VOCAB = 128      # stands in for len(english.vocab)
    EMB = 128
    HIDDEN = 128
    BATCH = 8
    SRC_LEN = 6
    TGT_LEN = 7

    root = jax.random.PRNGKey(0)
    kp, ks, kt, kf = jax.random.split(root, 4)

    params = init_params(kp, SRC_VOCAB, TGT_VOCAB, EMB, HIDDEN)
    source = jax.random.randint(ks, (SRC_LEN, BATCH), 0, SRC_VOCAB, jnp.int32)
    target = jax.random.randint(kt, (TGT_LEN, BATCH), 0, TGT_VOCAB, jnp.int32)

    fwd = jax.jit(seq2seq_forward)
    out = fwd(params, source, target, kf, 0.5)
    out = jax.block_until_ready(out)

    assert out.shape == (TGT_LEN, BATCH, TGT_VOCAB), out.shape
    assert bool(jnp.all(jnp.isfinite(out)))
    assert bool(jnp.all(out[0] == 0.0))
    # TODO(synk): original PyTorch forward has bugs (`outputs` reassignment,
    # `agrmax` typo); implemented the intended semantics (outputs[t] = step logits).
    print("KERNEL_OK")
</pallas_src>

<mosaic_0001>
module attributes {stable_mosaic.version = 11 : i64} {
  func.func @seq2seq_kernel(%arg0: memref<6xi32, #tpu.memory_space<smem>>, %arg1: memref<6x8x128xf32, #tpu.memory_space<vmem>>, %arg2: memref<8x128xf32, #tpu.memory_space<vmem>>, %arg3: memref<6x8x128xf32, #tpu.memory_space<vmem>>, %arg4: memref<256x512xbf16, #tpu.memory_space<vmem>>, %arg5: memref<1x512xf32, #tpu.memory_space<vmem>>, %arg6: memref<256x512xbf16, #tpu.memory_space<vmem>>, %arg7: memref<1x512xf32, #tpu.memory_space<vmem>>, %arg8: memref<128x128xbf16, #tpu.memory_space<vmem>>, %arg9: memref<1x128xf32, #tpu.memory_space<vmem>>, %arg10: memref<128x128xbf16, #tpu.memory_space<vmem>>, %arg11: memref<7x8x128xf32, #tpu.memory_space<vmem>>, %arg12: memref<8x256xf32, #tpu.memory_space<vmem>>, %arg13: memref<8x128xf32, #tpu.memory_space<vmem>>) attributes {dimension_semantics = [], scalar_prefetch = 0 : i64, scratch_operands = 2 : i64, tpu.core_type = #tpu.core_type<tc>} {
    %cst = arith.constant 0.000000e+00 : f32
    %0 = vector.broadcast %cst : f32 to vector<8x256xf32>
    %c0 = arith.constant 0 : index
    %c0_0 = arith.constant 0 : index
    %1 = vector.load %arg12[%c0, %c0_0] : memref<8x256xf32, #tpu.memory_space<vmem>>, vector<8x256xf32>
    tpu.vector_store %arg12[%c0, %c0_0], %0 {strides = array<i32>} : memref<8x256xf32, #tpu.memory_space<vmem>>, vector<8x256xf32>,
    %cst_1 = arith.constant 0.000000e+00 : f32
    %2 = vector.broadcast %cst_1 : f32 to vector<8x128xf32>
    %c0_2 = arith.constant 0 : index
    %c0_3 = arith.constant 0 : index
    %3 = vector.load %arg13[%c0_2, %c0_3] : memref<8x128xf32, #tpu.memory_space<vmem>>, vector<8x128xf32>
    tpu.vector_store %arg13[%c0_2, %c0_3], %2 {strides = array<i32>} : memref<8x128xf32, #tpu.memory_space<vmem>>, vector<8x128xf32>,
    %c0_i32 = arith.constant 0 : i32
    %c6_i32 = arith.constant 6 : i32
    %4 = arith.addi %c0_i32, %c6_i32 : i32
    %c1_i32 = arith.constant 1 : i32
    scf.for %arg14 = %c0_i32 to %4 step %c1_i32  : i32 {
      %c1_i32_17 = arith.constant 1 : i32
      %13 = arith.muli %arg14, %c1_i32_17 : i32
      %c0_i32_18 = arith.constant 0 : i32
      %14 = arith.addi %c0_i32_18, %13 : i32
      %15 = arith.index_cast %14 : i32 to index
      %c0_19 = arith.constant 0 : index
      %c0_20 = arith.constant 0 : index
      %16 = vector.load %arg1[%15, %c0_19, %c0_20] : memref<6x8x128xf32, #tpu.memory_space<vmem>>, vector<1x8x128xf32>
      %17 = vector.shape_cast %16 : vector<1x8x128xf32> to vector<8x128xf32>
      %c0_21 = arith.constant 0 : index
      %c0_22 = arith.constant 0 : index
      %18 = vector.load %arg12[%c0_21, %c0_22] : memref<8x256xf32, #tpu.memory_space<vmem>>, vector<8x128xf32>
      tpu.vector_store %arg12[%c0_21, %c0_22], %17 {strides = array<i32>} : memref<8x256xf32, #tpu.memory_space<vmem>>, vector<8x128xf32>,
      %c0_23 = arith.constant 0 : index
      %c0_24 = arith.constant 0 : index
      %19 = vector.load %arg12[%c0_23, %c0_24] : memref<8x256xf32, #tpu.memory_space<vmem>>, vector<8x256xf32>
      %c0_25 = arith.constant 0 : index
      %c0_26 = arith.constant 0 : index
      %20 = vector.load %arg13[%c0_25, %c0_26] : memref<8x128xf32, #tpu.memory_space<vmem>>, vector<8x128xf32>
      %21 = arith.truncf %19 : vector<8x256xf32> to vector<8x256xbf16>
      %c0_27 = arith.constant 0 : index
      %c0_28 = arith.constant 0 : index
      %22 = vector.load %arg4[%c0_27, %c0_28] : memref<256x512xbf16, #tpu.memory_space<vmem>>, vector<256x512xbf16>
      %cst_29 = arith.constant dense<0.000000e+00> : vector<8x512xf32>
      %23 = tpu.matmul %21, %22, %cst_29 {dimension_numbers = #tpu.dot_dimension_numbers<[1], [0], [0], [1], [0, 0, 1, 1], [], []>} : vector<8x256xbf16>, vector<256x512xbf16>, vector<8x512xf32> -> vector<8x512xf32>
      %c0_30 = arith.constant 0 : index
      %c0_31 = arith.constant 0 : index
      %24 = vector.load %arg5[%c0_30, %c0_31] : memref<1x512xf32, #tpu.memory_space<vmem>>, vector<1x512xf32>
      %25 = vector.broadcast %24 : vector<1x512xf32> to vector<8x512xf32>
      %26 = arith.addf %23, %25 : vector<8x512xf32>
      %27 = vector.extract_strided_slice %26 {offsets = [0, 0], sizes = [8, 128], strides = [1, 1]} : vector<8x512xf32> to vector<8x128xf32>
      %28 = arith.negf %27 : vector<8x128xf32>
      %29 = math.exp %28 : vector<8x128xf32>
      %cst_32 = arith.constant 1.000000e+00 : f32
      %30 = vector.broadcast %cst_32 : f32 to vector<8x128xf32>
      %31 = arith.addf %30, %29 : vector<8x128xf32>
      %32 = arith.divf %30, %31 : vector<8x128xf32>
      %33 = vector.extract_strided_slice %26 {offsets = [0, 128], sizes = [8, 128], strides = [1, 1]} : vector<8x512xf32> to vector<8x128xf32>
      %34 = arith.negf %33 : vector<8x128xf32>
      %35 = math.exp %34 : vector<8x128xf32>
      %cst_33 = arith.constant 1.000000e+00 : f32
      %36 = vector.broadcast %cst_33 : f32 to vector<8x128xf32>
      %37 = arith.addf %36, %35 : vector<8x128xf32>
      %38 = arith.divf %36, %37 : vector<8x128xf32>
      %39 = vector.extract_strided_slice %26 {offsets = [0, 256], sizes = [8, 128], strides = [1, 1]} : vector<8x512xf32> to vector<8x128xf32>
      %40 = math.tanh %39 : vector<8x128xf32>
      %41 = vector.extract_strided_slice %26 {offsets = [0, 384], sizes = [8, 128], strides = [1, 1]} : vector<8x512xf32> to vector<8x128xf32>
      %42 = arith.negf %41 : vector<8x128xf32>
      %43 = math.exp %42 : vector<8x128xf32>
      %cst_34 = arith.constant 1.000000e+00 : f32
      %44 = vector.broadcast %cst_34 : f32 to vector<8x128xf32>
      %45 = arith.addf %44, %43 : vector<8x128xf32>
      %46 = arith.divf %44, %45 : vector<8x128xf32>
      %47 = arith.mulf %38, %20 : vector<8x128xf32>
      %48 = arith.mulf %32, %40 : vector<8x128xf32>
      %49 = arith.addf %47, %48 : vector<8x128xf32>
      %50 = math.tanh %49 : vector<8x128xf32>
      %51 = arith.mulf %46, %50 : vector<8x128xf32>
      %c0_35 = arith.constant 0 : index
      %c128 = arith.constant 128 : index
      %52 = vector.load %arg12[%c0_35, %c128] : memref<8x256xf32, #tpu.memory_space<vmem>>, vector<8x128xf32>
      tpu.vector_store %arg12[%c0_35, %c128], %51 {strides = array<i32>} : memref<8x256xf32, #tpu.memory_space<vmem>>, vector<8x128xf32>,
      %c0_36 = arith.constant 0 : index
      %c0_37 = arith.constant 0 : index
      %53 = vector.load %arg13[%c0_36, %c0_37] : memref<8x128xf32, #tpu.memory_space<vmem>>, vector<8x128xf32>
      tpu.vector_store %arg13[%c0_36, %c0_37], %49 {strides = array<i32>} : memref<8x128xf32, #tpu.memory_space<vmem>>, vector<8x128xf32>,
    }
    %c6_i32_4 = arith.constant 6 : i32
    %cst_5 = arith.constant 0.000000e+00 : f32
    %5 = vector.broadcast %cst_5 : f32 to vector<8x128xf32>
    %c0_6 = arith.constant 0 : index
    %c0_7 = arith.constant 0 : index
    %c0_8 = arith.constant 0 : index
    %6 = vector.load %arg11[%c0_6, %c0_7, %c0_8] : memref<7x8x128xf32, #tpu.memory_space<vmem>>, vector<1x8x128xf32>
    %7 = vector.shape_cast %6 : vector<1x8x128xf32> to vector<8x128xf32>
    %8 = vector.shape_cast %5 : vector<8x128xf32> to vector<1x8x128xf32>
    tpu.vector_store %arg11[%c0_6, %c0_7, %c0_8], %8 {strides = array<i32>} : memref<7x8x128xf32, #tpu.memory_space<vmem>>, vector<1x8x128xf32>,
    %c0_9 = arith.constant 0 : index
    %c0_10 = arith.constant 0 : index
    %9 = vector.load %arg2[%c0_9, %c0_10] : memref<8x128xf32, #tpu.memory_space<vmem>>, vector<8x128xf32>
    %c0_11 = arith.constant 0 : index
    %c0_12 = arith.constant 0 : index
    %10 = vector.load %arg12[%c0_11, %c0_12] : memref<8x256xf32, #tpu.memory_space<vmem>>, vector<8x128xf32>
    tpu.vector_store %arg12[%c0_11, %c0_12], %9 {strides = array<i32>} : memref<8x256xf32, #tpu.memory_space<vmem>>, vector<8x128xf32>,
    %11 = tpu.iota {dimensions = array<i32: 1>} : vector<8x128xi32>
    %c0_i32_13 = arith.constant 0 : i32
    %c6_i32_14 = arith.constant 6 : i32
    %12 = arith.addi %c0_i32_13, %c6_i32_14 : i32
    %c1_i32_15 = arith.constant 1 : i32
    scf.for %arg14 = %c0_i32_13 to %12 step %c1_i32_15  : i32 {
      %c1_i32_17 = arith.constant 1 : i32
      %13 = arith.muli %arg14, %c1_i32_17 : i32
      %c0_i32_18 = arith.constant 0 : i32
      %14 = arith.addi %c0_i32_18, %13 : i32
      %c0_19 = arith.constant 0 : index
      %c0_20 = arith.constant 0 : index
      %15 = vector.load %arg12[%c0_19, %c0_20] : memref<8x256xf32, #tpu.memory_space<vmem>>, vector<8x256xf32>
      %c0_21 = arith.constant 0 : index
      %c0_22 = arith.constant 0 : index
      %16 = vector.load %arg13[%c0_21, %c0_22] : memref<8x128xf32, #tpu.memory_space<vmem>>, vector<8x128xf32>
      %17 = arith.truncf %15 : vector<8x256xf32> to vector<8x256xbf16>
      %c0_23 = arith.constant 0 : index
      %c0_24 = arith.constant 0 : index
      %18 = vector.load %arg6[%c0_23, %c0_24] : memref<256x512xbf16, #tpu.memory_space<vmem>>, vector<256x512xbf16>
      %cst_25 = arith.constant dense<0.000000e+00> : vector<8x512xf32>
      %19 = tpu.matmul %17, %18, %cst_25 {dimension_numbers = #tpu.dot_dimension_numbers<[1], [0], [0], [1], [0, 0, 1, 1], [], []>} : vector<8x256xbf16>, vector<256x512xbf16>, vector<8x512xf32> -> vector<8x512xf32>
      %c0_26 = arith.constant 0 : index
      %c0_27 = arith.constant 0 : index
      %20 = vector.load %arg7[%c0_26, %c0_27] : memref<1x512xf32, #tpu.memory_space<vmem>>, vector<1x512xf32>
      %21 = vector.broadcast %20 : vector<1x512xf32> to vector<8x512xf32>
      %22 = arith.addf %19, %21 : vector<8x512xf32>
      %23 = vector.extract_strided_slice %22 {offsets = [0, 0], sizes = [8, 128], strides = [1, 1]} : vector<8x512xf32> to vector<8x128xf32>
      %24 = arith.negf %23 : vector<8x128xf32>
      %25 = math.exp %24 : vector<8x128xf32>
      %cst_28 = arith.constant 1.000000e+00 : f32
      %26 = vector.broadcast %cst_28 : f32 to vector<8x128xf32>
      %27 = arith.addf %26, %25 : vector<8x128xf32>
      %28 = arith.divf %26, %27 : vector<8x128xf32>
      %29 = vector.extract_strided_slice %22 {offsets = [0, 128], sizes = [8, 128], strides = [1, 1]} : vector<8x512xf32> to vector<8x128xf32>
      %30 = arith.negf %29 : vector<8x128xf32>
      %31 = math.exp %30 : vector<8x128xf32>
      %cst_29 = arith.constant 1.000000e+00 : f32
      %32 = vector.broadcast %cst_29 : f32 to vector<8x128xf32>
      %33 = arith.addf %32, %31 : vector<8x128xf32>
      %34 = arith.divf %32, %33 : vector<8x128xf32>
      %35 = vector.extract_strided_slice %22 {offsets = [0, 256], sizes = [8, 128], strides = [1, 1]} : vector<8x512xf32> to vector<8x128xf32>
      %36 = math.tanh %35 : vector<8x128xf32>
      %37 = vector.extract_strided_slice %22 {offsets = [0, 384], sizes = [8, 128], strides = [1, 1]} : vector<8x512xf32> to vector<8x128xf32>
      %38 = arith.negf %37 : vector<8x128xf32>
      %39 = math.exp %38 : vector<8x128xf32>
      %cst_30 = arith.constant 1.000000e+00 : f32
      %40 = vector.broadcast %cst_30 : f32 to vector<8x128xf32>
      %41 = arith.addf %40, %39 : vector<8x128xf32>
      %42 = arith.divf %40, %41 : vector<8x128xf32>
      %43 = arith.mulf %34, %16 : vector<8x128xf32>
      %44 = arith.mulf %28, %36 : vector<8x128xf32>
      %45 = arith.addf %43, %44 : vector<8x128xf32>
      %46 = math.tanh %45 : vector<8x128xf32>
      %47 = arith.mulf %42, %46 : vector<8x128xf32>
      %c0_31 = arith.constant 0 : index
      %c128 = arith.constant 128 : index
      %48 = vector.load %arg12[%c0_31, %c128] : memref<8x256xf32, #tpu.memory_space<vmem>>, vector<8x128xf32>
      tpu.vector_store %arg12[%c0_31, %c128], %47 {strides = array<i32>} : memref<8x256xf32, #tpu.memory_space<vmem>>, vector<8x128xf32>,
      %c0_32 = arith.constant 0 : index
      %c0_33 = arith.constant 0 : index
      %49 = vector.load %arg13[%c0_32, %c0_33] : memref<8x128xf32, #tpu.memory_space<vmem>>, vector<8x128xf32>
      tpu.vector_store %arg13[%c0_32, %c0_33], %45 {strides = array<i32>} : memref<8x128xf32, #tpu.memory_space<vmem>>, vector<8x128xf32>,
      %50 = arith.truncf %47 : vector<8x128xf32> to vector<8x128xbf16>
      %c0_34 = arith.constant 0 : index
      %c0_35 = arith.constant 0 : index
      %51 = vector.load %arg8[%c0_34, %c0_35] : memref<128x128xbf16, #tpu.memory_space<vmem>>, vector<128x128xbf16>
      %cst_36 = arith.constant dense<0.000000e+00> : vector<8x128xf32>
      %52 = tpu.matmul %50, %51, %cst_36 {dimension_numbers = #tpu.dot_dimension_numbers<[1], [0], [0], [1], [0, 0, 1, 1], [], []>} : vector<8x128xbf16>, vector<128x128xbf16>, vector<8x128xf32> -> vector<8x128xf32>
      %c0_37 = arith.constant 0 : index
      %c0_38 = arith.constant 0 : index
      %53 = vector.load %arg9[%c0_37, %c0_38] : memref<1x128xf32, #tpu.memory_space<vmem>>, vector<1x128xf32>
      %54 = vector.broadcast %53 : vector<1x128xf32> to vector<8x128xf32>
      %55 = arith.addf %52, %54 : vector<8x128xf32>
      %c1_i32_39 = arith.constant 1 : i32
      %56 = arith.addi %14, %c1_i32_39 : i32
      %57 = arith.index_cast %56 : i32 to index
      %c0_40 = arith.constant 0 : index
      %c0_41 = arith.constant 0 : index
      %58 = vector.load %arg11[%57, %c0_40, %c0_41] : memref<7x8x128xf32, #tpu.memory_space<vmem>>, vector<1x8x128xf32>
      %59 = vector.shape_cast %58 : vector<1x8x128xf32> to vector<8x128xf32>
      %60 = vector.shape_cast %55 : vector<8x128xf32> to vector<1x8x128xf32>
      tpu.vector_store %arg11[%57, %c0_40, %c0_41], %60 {strides = array<i32>} : memref<7x8x128xf32, #tpu.memory_space<vmem>>, vector<1x8x128xf32>,
      %c5_i32 = arith.constant 5 : i32
      %61 = arith.cmpi slt, %14, %c5_i32 : i32
      %62 = arith.extui %61 : i1 to i32
      %c0_i32_42 = arith.constant 0 : i32
      %63 = arith.cmpi ne, %62, %c0_i32_42 : i32
      scf.if %63 {
        %64 = arith.index_cast %14 : i32 to index
        %65 = memref.load %arg0[%64] : memref<6xi32, #tpu.memory_space<smem>>
        %c0_i32_43 = arith.constant 0 : i32
        %66 = arith.cmpi ne, %65, %c0_i32_43 : i32
        %67 = arith.extui %66 : i1 to i32
        %c0_i32_44 = arith.constant 0 : i32
        %68 = arith.cmpi ne, %67, %c0_i32_44 : i32
        scf.if %68 {
          %72 = arith.index_cast %14 : i32 to index
          %c0_47 = arith.constant 0 : index
          %c0_48 = arith.constant 0 : index
          %73 = vector.load %arg3[%72, %c0_47, %c0_48] : memref<6x8x128xf32, #tpu.memory_space<vmem>>, vector<1x8x128xf32>
          %74 = vector.shape_cast %73 : vector<1x8x128xf32> to vector<8x128xf32>
          %c0_49 = arith.constant 0 : index
          %c0_50 = arith.constant 0 : index
          %75 = vector.load %arg12[%c0_49, %c0_50] : memref<8x256xf32, #tpu.memory_space<vmem>>, vector<8x128xf32>
          tpu.vector_store %arg12[%c0_49, %c0_50], %74 {strides = array<i32>} : memref<8x256xf32, #tpu.memory_space<vmem>>, vector<8x128xf32>,
        } else {
        }
        %c0_i32_45 = arith.constant 0 : i32
        %69 = arith.cmpi eq, %65, %c0_i32_45 : i32
        %70 = arith.extui %69 : i1 to i32
        %c0_i32_46 = arith.constant 0 : i32
        %71 = arith.cmpi ne, %70, %c0_i32_46 : i32
        scf.if %71 {
          %cst_47 = arith.constant dense<0xFF800000> : vector<8xf32>
          %72 = vector.multi_reduction <maximumf>, %55, %cst_47 [1] : vector<8x128xf32> to vector<8xf32>
          %73 = vector.shape_cast %72 : vector<8xf32> to vector<8x1xf32>
          %74 = vector.broadcast %73 : vector<8x1xf32> to vector<8x128xf32>
          %75 = arith.cmpf oeq, %55, %74 : vector<8x128xf32>
          %c128_i32 = arith.constant 128 : i32
          %76 = vector.broadcast %c128_i32 : i32 to vector<8x128xi32>
          %77 = arith.select %75, %11, %76 : vector<8x128xi1>, vector<8x128xi32>
          %cst_48 = arith.constant dense<2147483647> : vector<8xi32>
          %78 = vector.multi_reduction <minsi>, %77, %cst_48 [1] : vector<8x128xi32> to vector<8xi32>
          %79 = vector.shape_cast %78 : vector<8xi32> to vector<8x1xi32>
          %80 = vector.broadcast %79 : vector<8x1xi32> to vector<8x128xi32>
          %81 = arith.cmpi eq, %11, %80 : vector<8x128xi32>
          %82 = arith.extui %81 : vector<8x128xi1> to vector<8x128xi32>
          %83 = arith.sitofp %82 : vector<8x128xi32> to vector<8x128xf32>
          %84 = arith.truncf %83 : vector<8x128xf32> to vector<8x128xbf16>
          %c0_49 = arith.constant 0 : index
          %c0_50 = arith.constant 0 : index
          %85 = vector.load %arg10[%c0_49, %c0_50] : memref<128x128xbf16, #tpu.memory_space<vmem>>, vector<128x128xbf16>
          %cst_51 = arith.constant dense<0.000000e+00> : vector<8x128xf32>
          %86 = tpu.matmul %84, %85, %cst_51 {dimension_numbers = #tpu.dot_dimension_numbers<[1], [0], [0], [1], [0, 0, 1, 1], [], []>} : vector<8x128xbf16>, vector<128x128xbf16>, vector<8x128xf32> -> vector<8x128xf32>
          %c0_52 = arith.constant 0 : index
          %c0_53 = arith.constant 0 : index
          %87 = vector.load %arg12[%c0_52, %c0_53] : memref<8x256xf32, #tpu.memory_space<vmem>>, vector<8x128xf32>
          tpu.vector_store %arg12[%c0_52, %c0_53], %86 {strides = array<i32>} : memref<8x256xf32, #tpu.memory_space<vmem>>, vector<8x128xf32>,
        } else {
        }
      } else {
      }
    }
    %c6_i32_16 = arith.constant 6 : i32
    return
  }
}

</mosaic_0001>

<bundles_post_ra>
// kernel: seq2seq_forward.1
= control target key start
LH: loop header
LB: loop body
LE: loop exit
PB: predicated region body
PF: predicated region fallthrough
CT: control target
= control target key end

     0   :  { %16 = vsyncpa [#allocation7], 0  ;;  %s2398_s0 = inlined_call_operand.vmem [shape: s32[6], index: 0, kind: input, shape index: {}]   ;;  %s2399_s1 = inlined_call_operand.vmem [shape: f32[6,8,128], index: 1, kind: input, shape index: {}]   ;;  %s2400_s2 = inlined_call_operand.vmem [shape: f32[8,128], index: 2, kind: input, shape index: {}]   ;;  %s2401_s3 = inlined_call_operand.vmem [shape: f32[6,8,128], index: 3, kind: input, shape index: {}]   ;;  %s2402_s4 = inlined_call_operand.vmem [shape: bf16[256,512], index: 4, kind: input, shape index: {}]   ;;  %s2403_s5 = inlined_call_operand.vmem [shape: f32[1,512], index: 5, kind: input, shape index: {}]   ;;  %s2404_s6 = inlined_call_operand.hbm [shape: bf16[256,512], index: 6, kind: input, shape index: {}]   ;;  %s2405_s7 = inlined_call_operand.vmem [shape: f32[1,512], index: 7, kind: input, shape index: {}]   ;;  %s2406_s8 = inlined_call_operand.vmem [shape: bf16[128,128], index: 8, kind: input, shape index: {}]   ;;  %s2407_s9 = inlined_call_operand.vmem [shape: f32[1,128], index: 9, kind: input, shape index: {}]   ;;  %s2408_s10 = inlined_call_operand.vmem [shape: bf16[128,128], index: 10, kind: input, shape index: {}]   ;;  %s2409_s11 = inlined_call_operand.hbm [shape: f32[7,8,128], index: 11, kind: output, shape index: {}]  }
   0x1   :  { %17 = vsyncpa [#allocation5], 0 }
   0x2   :  { %18 = vsyncpa [#allocation6], 0  ;;  %s25_s19 = sshll.u32 %s2398_s0, 4  ;;  %s26_s19 = int_to_ptr.vmem [resolvable:$true] %s25_s19 }
   0x3   :  { %s1912_s20 = scalar_lea.vmem %s26_s19, 16  ;;  %p1917_p1 = scmp.lt.s32.totalorder %s26_s19, %s26_s19 }
   0x4   :  { %p1913_p0 = scmp.ne.s32.totalorder %s26_s19, %s1912_s20  ;;  %p1918_p2 = scmp.lt.s32.totalorder %s1912_s20, %s1912_s20 }
   0x6   :  { %p1919_p3 = por %p1918_p2, %p1917_p1 }
   0x8   :  { %p1920_p4 = pnand %p1919_p3, %p1913_p0 }
   0xa   :  { %1923 = shalt.err (!%p1920_p4)
}
   0xb   :  { %s1990_s21 = smov [#allocation4]   ;;  %s1991_s22 = smov [#allocation8]  }
   0xc   :  { %28 = dma.vmem_to_smem %s26_s19, 16, %s1990_s21, [#allocation7]  }
   0xd   :  { %s44_s23 = sshll.u32 %s1991_s22, 4  ;;  %s1924_s26 = scalar_lea.hbm %s2404_s6, 8192  ;;  %s45_s23 = int_to_ptr.vmem [resolvable:$true] %s44_s23 }
   0xe   :  { %p1925_p5 = scmp.ne.s32.totalorder %s2404_s6, %s1924_s26  ;;  %p1928_p6 = scmp.lt.u32.totalorder %s1924_s26, %s2404_s6 }
  0x10   :  { %p1930_p7 = pnand %p1928_p6, %p1925_p5 }
  0x12   :  { %1933 = shalt.err (!%p1930_p7)
}
  0x13   :  { %s1934_s30 = scalar_lea.vmem %s45_s23, 8192  ;;  %p1939_p9 = scmp.lt.s32.totalorder %s45_s23, %s45_s23 }
  0x14   :  { %p1935_p8 = scmp.ne.s32.totalorder %s45_s23, %s1934_s30  ;;  %p1940_p10 = scmp.lt.s32.totalorder %s1934_s30, %s1934_s30 }
  0x16   :  { %p1941_p11 = por %p1940_p10, %p1939_p9 }
  0x18   :  { %p1942_p12 = pnand %p1941_p11, %p1935_p8 }
  0x1a   :  { %1945 = shalt.err (!%p1942_p12)
}
  0x1b   :  { %s1992_s12 = smov 256   ;;  %s1993_s13 = smov 16  }
  0x1c   :  { %50 = dma.hbm_to_vmem [thread:$0]  %s2404_s6, 8192, %s45_s23, [#allocation5], %s1992_s12, %s1992_s12, %s1993_s13  }
  0x1d   :  { %1976 = dma.done.wait [#allocation7], 16  }
  0x1e   :  { %1977 = vsyncadd [#allocation7], 4294967280 }
  0x1f   :  { %1978 = dma.done.wait [#allocation5], 8192  }
  0x20   :  { %1979 = vsyncadd [#allocation5], 4294959104 }
  0x21   :  { %65 = sfence }
  0x22   :  { %v1994_v0 = vmov 0.0   ;;  %s2081_s16 = smov 0  }
  0x23   :  { %67 = vst [vmem:[#allocation2] sm:$0xff] %v1994_v0  ;;  %68 = vst [vmem:[#allocation2 + $0x8] sm:$0xff] %v1994_v0 }
  0x24   :  { %69 = vst [vmem:[#allocation3] sm:$0xff] %v1994_v0 }
  0x25 LB: > { %v1672_v1 = vld [vmem:[%s2402_s4 + $0x4] ss:$16 sps:$4 sm:$0xff]   ;;  %v1674_v2 = vld [vmem:[%s2402_s4] ss:$16 sps:$4 sm:$0xff]   ;;  %v1683_v6 = vld [vmem:[%s2402_s4 + $0xc] ss:$16 sps:$4 sm:$0xff]   ;;  %s1984_s16 = sphi %s2081_s16, %s75_s16  }
  0x26   : > { %491 = vmatprep.subr.bf16.mxu0 %v1672_v1  ;;  %v1675_v3 = vld [vmem:[%s2402_s4 + $0x24] ss:$16 sps:$4 sm:$0xff]   ;;  %v1677_v4 = vld [vmem:[%s2402_s4 + $0x20] ss:$16 sps:$4 sm:$0xff]   ;;  %v1686_v7 = vld [vmem:[%s2402_s4 + $0x8] ss:$16 sps:$4 sm:$0xff]   ;;  %532 = vmatprep.subr.bf16.mxu1 %v1683_v6  ;;  %v151_v6 = vlaneseq }
  0x27   : > { %492 = vmatpush1.bf16.msra.mxu0 %v1674_v2  ;;  %v1678_v5 = vld [vmem:[%s2402_s4 + $0x44] ss:$16 sps:$4 sm:$0xff]   ;;  %v1680_v8 = vld [vmem:[%s2402_s4 + $0x40] ss:$16 sps:$4 sm:$0xff]   ;;  %533 = vmatpush1.bf16.msra.mxu1 %v1686_v7  ;;  %v1689_v10 = vld [vmem:[%s2402_s4 + $0x2c] ss:$16 sps:$4 sm:$0xff]  }
  0x28   : > { %493 = vmatprep.subr.bf16.mxu0 %v1675_v3  ;;  %v1681_v9 = vld [vmem:[%s2402_s4 + $0x64] ss:$16 sps:$4 sm:$0xff]   ;;  %v1692_v11 = vld [vmem:[%s2402_s4 + $0x28] ss:$16 sps:$4 sm:$0xff]   ;;  %534 = vmatprep.subr.bf16.mxu1 %v1689_v10  ;;  %v1685_v12 = vld [vmem:[%s2402_s4 + $0x60] ss:$16 sps:$4 sm:$0xff]  }
  0x29   : > { %v1687_v13 = vld [vmem:[%s2402_s4 + $0x84] ss:$16 sps:$4 sm:$0xff]   ;;  %v1695_v14 = vld [vmem:[%s2402_s4 + $0x4c] ss:$16 sps:$4 sm:$0xff]   ;;  %v1698_v15 = vld [vmem:[%s2402_s4 + $0x48] ss:$16 sps:$4 sm:$0xff]  }
  0x2a   : > { %v1701_v16 = vld [vmem:[%s2402_s4 + $0x6c] ss:$16 sps:$4 sm:$0xff]   ;;  %v1691_v17 = vld [vmem:[%s2402_s4 + $0x80] ss:$16 sps:$4 sm:$0xff]   ;;  %v1693_v18 = vld [vmem:[%s2402_s4 + $0xa4] ss:$16 sps:$4 sm:$0xff]  }
  0x2b   : > { %494 = vmatpush1.bf16.msra.mxu0 %v1677_v4  ;;  %535 = vmatpush1.bf16.msra.mxu1 %v1692_v11  ;;  %v1704_v19 = vld [vmem:[%s2402_s4 + $0x68] ss:$16 sps:$4 sm:$0xff]   ;;  %v1707_v20 = vld [vmem:[%s2402_s4 + $0x8c] ss:$16 sps:$4 sm:$0xff]   ;;  %v1697_v21 = vld [vmem:[%s2402_s4 + $0xa0] ss:$16 sps:$4 sm:$0xff]  }
  0x2c   : > { %495 = vmatprep.subr.bf16.mxu0 %v1678_v5  ;;  %536 = vmatprep.subr.bf16.mxu1 %v1695_v14  ;;  %v1699_v22 = vld [vmem:[%s2402_s4 + $0xc4] ss:$16 sps:$4 sm:$0xff]   ;;  %v1710_v23 = vld [vmem:[%s2402_s4 + $0x88] ss:$16 sps:$4 sm:$0xff]   ;;  %v1713_v24 = vld [vmem:[%s2402_s4 + $0xac] ss:$16 sps:$4 sm:$0xff]  }
  0x2d   : > { %v1703_v25 = vld [vmem:[%s2402_s4 + $0xc0] ss:$16 sps:$4 sm:$0xff]   ;;  %v1705_v26 = vld [vmem:[%s2402_s4 + $0xe4] ss:$16 sps:$4 sm:$0xff]   ;;  %v1716_v27 = vld [vmem:[%s2402_s4 + $0xa8] ss:$16 sps:$4 sm:$0xff]  }
  0x2e   : > { %v1719_v28 = vld [vmem:[%s2402_s4 + $0xcc] ss:$16 sps:$4 sm:$0xff]   ;;  %v1709_v29 = vld [vmem:[%s2402_s4 + $0xe0] ss:$16 sps:$4 sm:$0xff]   ;;  %v1711_v30 = vld [vmem:[%s2402_s4 + $0x104] ss:$16 sps:$4 sm:$0xff]  }
  0x2f   : > { %496 = vmatpush1.bf16.msra.mxu0 %v1680_v8  ;;  %537 = vmatpush1.bf16.msra.mxu1 %v1698_v15  ;;  %v1722_v31 = vld [vmem:[%s2402_s4 + $0xc8] ss:$16 sps:$4 sm:$0xff]   ;;  %v1725_v32 = vld [vmem:[%s2402_s4 + $0xec] ss:$16 sps:$4 sm:$0xff]   ;;  %v1715_v33 = vld [vmem:[%s2402_s4 + $0x100] ss:$16 sps:$4 sm:$0xff]  }
  0x30   : > { %497 = vmatprep.subr.bf16.mxu0 %v1681_v9  ;;  %538 = vmatprep.subr.bf16.mxu1 %v1701_v16  ;;  %v1717_v34 = vld [vmem:[%s2402_s4 + $0x124] ss:$16 sps:$4 sm:$0xff]   ;;  %v1728_v35 = vld [vmem:[%s2402_s4 + $0xe8] ss:$16 sps:$4 sm:$0xff]   ;;  %v1731_v36 = vld [vmem:[%s2402_s4 + $0x10c] ss:$16 sps:$4 sm:$0xff]  }
  0x31   : > { %s1424_s28 = sshll.u32 %s1984_s16, 3  ;;  %v1721_v37 = vld [vmem:[%s2402_s4 + $0x120] ss:$16 sps:$4 sm:$0xff]   ;;  %v1723_v38 = vld [vmem:[%s2402_s4 + $0x144] ss:$16 sps:$4 sm:$0xff]   ;;  %v81_v42 = vld [vmem:[#allocation2 + $0x8] sm:$0xff] }
  0x32   : > { %v1734_v39 = vld [vmem:[%s2402_s4 + $0x108] ss:$16 sps:$4 sm:$0xff]   ;;  %s77_s17 = scalar_lea.vmem %s2399_s1, %s1424_s28  ;;  %v1737_v40 = vld [vmem:[%s2402_s4 + $0x12c] ss:$16 sps:$4 sm:$0xff]   ;;  %v1727_v41 = vld [vmem:[%s2402_s4 + $0x140] ss:$16 sps:$4 sm:$0xff]   ;;  %v84_v43 = vpack.c.bf16 %v81_v42, %v81_v42 }
  0x33   : > { %498 = vmatpush1.bf16.msra.mxu0 %v1685_v12  ;;  %539 = vmatpush1.bf16.msra.mxu1 %v1704_v19  ;;  %v78_v44 = vld [vmem:[%s77_s17] sm:$0xff]  ;;  %v1740_v46 = vld [vmem:[%s2402_s4 + $0x128] ss:$16 sps:$4 sm:$0xff]   ;;  %v1743_v47 = vld [vmem:[%s2402_s4 + $0x14c] ss:$16 sps:$4 sm:$0xff]   ;;  %v2282_v7 = vshrl.u32 %v151_v6, 7 }
  0x34   : > { %499 = vmatprep.subr.bf16.mxu0 %v1687_v13  ;;  %540 = vmatprep.subr.bf16.mxu1 %v1707_v20  ;;  %v1729_v45 = vld [vmem:[%s2402_s4 + $0x164] ss:$16 sps:$4 sm:$0xff]   ;;  %79 = vst [vmem:[#allocation2] sm:$0xff] %v78_v44  ;;  %v1733_v48 = vld [vmem:[%s2402_s4 + $0x160] ss:$16 sps:$4 sm:$0xff]   ;;  %v83_v4 = vpack.c.bf16 %v78_v44, %v78_v44  ;;  %s75_s16 = sadd.s32 1, %s1984_s16  }
  0x35   : > { %523 = vmatprep.mubr.bf16.mxu0 %v84_v43  ;;  %564 = vmatprep.mubr.bf16.mxu1 %v84_v43  ;;  %v1735_v49 = vld [vmem:[%s2402_s4 + $0x184] ss:$16 sps:$4 sm:$0xff]   ;;  %v1746_v50 = vld [vmem:[%s2402_s4 + $0x148] ss:$16 sps:$4 sm:$0xff]   ;;  %v1749_v51 = vld [vmem:[%s2402_s4 + $0x16c] ss:$16 sps:$4 sm:$0xff]  }
  0x36   : > { %v1739_v52 = vld [vmem:[%s2402_s4 + $0x180] ss:$16 sps:$4 sm:$0xff]   ;;  %v1741_v53 = vld [vmem:[%s2402_s4 + $0x1a4] ss:$16 sps:$4 sm:$0xff]   ;;  %v1752_v54 = vld [vmem:[%s2402_s4 + $0x168] ss:$16 sps:$4 sm:$0xff]  }
  0x37   : > { %500 = vmatpush1.bf16.msra.mxu0 %v1691_v17  ;;  %541 = vmatpush1.bf16.msra.mxu1 %v1710_v23  ;;  %v1755_v55 = vld [vmem:[%s2402_s4 + $0x18c] ss:$16 sps:$4 sm:$0xff]   ;;  %v1745_v56 = vld [vmem:[%s2402_s4 + $0x1a0] ss:$16 sps:$4 sm:$0xff]   ;;  %v1747_v57 = vld [vmem:[%s2402_s4 + $0x1c4] ss:$16 sps:$4 sm:$0xff]  }
  0x38   : > { %501 = vmatprep.subr.bf16.mxu0 %v1693_v18  ;;  %542 = vmatprep.subr.bf16.mxu1 %v1713_v24  ;;  %v1758_v58 = vld [vmem:[%s2402_s4 + $0x188] ss:$16 sps:$4 sm:$0xff]   ;;  %v1759_v59 = vld [vmem:[%s2402_s4 + $0x1ac] ss:$16 sps:$4 sm:$0xff]   ;;  %v1751_v60 = vld [vmem:[%s2402_s4 + $0x1c0] ss:$16 sps:$4 sm:$0xff]  }
  0x39   : > { %v1753_v61 = vld [vmem:[%s2402_s4 + $0x1e4] ss:$16 sps:$4 sm:$0xff]   ;;  %v1761_v62 = vld [vmem:[%s2402_s4 + $0x1a8] ss:$16 sps:$4 sm:$0xff]   ;;  %v1762_v63 = vld [vmem:[%s2402_s4 + $0x1cc] ss:$16 sps:$4 sm:$0xff]  }
  0x3a   : > { %v1757_v1 = vld [vmem:[%s2402_s4 + $0x1e0] ss:$16 sps:$4 sm:$0xff]   ;;  %v1764_v2 = vld [vmem:[%s2402_s4 + $0x1c8] ss:$16 sps:$4 sm:$0xff]   ;;  %v1765_v3 = vld [vmem:[%s2402_s4 + $0x1ec] ss:$16 sps:$4 sm:$0xff]  }
  0x3b   : > { %502 = vmatpush1.bf16.msra.mxu0 %v1697_v21  ;;  %543 = vmatpush1.bf16.msra.mxu1 %v1716_v27  ;;  %v1767_v5 = vld [vmem:[%s2402_s4 + $0x1e8] ss:$16 sps:$4 sm:$0xff]   ;;  %v153_v8 = vsub.s32 0, %v2282_v7  ;;  %v149_v9 = vld [vmem:[%s2403_s5] sm:$0xf]  ;;  %v157_v10 = vsub.s32 1, %v2282_v7 }
  0x3c   : > { %503 = vmatprep.subr.bf16.mxu0 %v1699_v22  ;;  %544 = vmatprep.subr.bf16.mxu1 %v1719_v28  ;;  %v165_v13 = vsub.s32 3, %v2282_v7  ;;  %v161_v23 = vsub.s32 2, %v2282_v7  ;;  %p72_p13 = scmp.ge.s32.totalorder %s75_s16, 6  }
  0x3d   : > { %v154_v11 = vrot.slane %v149_v9, %v153_v8  ;;  %v158_v12 = vrot.slane %v149_v9, %v157_v10  ;;  %599 = vst [vmem:[#allocation9] sm:$0xff] (%p72_p13), %v1994_v0  ;;  %s2308_s12 = smov (%p72_p13), 0  }
  0x3e   : > { %v166_v21 = vrot.slane %v149_v9, %v165_v13  ;;  %v162_v28 = vrot.slane %v149_v9, %v161_v23 }
  0x3f   : > { %504 = vmatpush1.bf16.msra.mxu0 %v1703_v25  ;;  %545 = vmatpush1.bf16.msra.mxu1 %v1722_v31 }
  0x40   : > { %505 = vmatprep.subr.bf16.mxu0 %v1705_v26  ;;  %546 = vmatprep.subr.bf16.mxu1 %v1725_v32 }
  0x43   : > { %506 = vmatpush1.bf16.msra.mxu0 %v1709_v29  ;;  %547 = vmatpush1.bf16.msra.mxu1 %v1728_v35 }
  0x44   : > { %507 = vmatprep.subr.bf16.mxu0 %v1711_v30  ;;  %548 = vmatprep.subr.bf16.mxu1 %v1731_v36 }
  0x47   : > { %508 = vmatpush1.bf16.msra.mxu0 %v1715_v33  ;;  %549 = vmatpush1.bf16.msra.mxu1 %v1734_v39 }
  0x48   : > { %509 = vmatprep.subr.bf16.mxu0 %v1717_v34  ;;  %550 = vmatprep.subr.bf16.mxu1 %v1737_v40 }
  0x4b   : > { %510 = vmatpush1.bf16.msra.mxu0 %v1721_v37  ;;  %551 = vmatpush1.bf16.msra.mxu1 %v1740_v46 }
  0x4c   : > { %511 = vmatprep.subr.bf16.mxu0 %v1723_v38  ;;  %552 = vmatprep.subr.bf16.mxu1 %v1743_v47  ;;  %v82_v38 = vld [vmem:[#allocation3] sm:$0xff] }
  0x4f   : > { %512 = vmatpush1.bf16.msra.mxu0 %v1727_v41  ;;  %553 = vmatpush1.bf16.msra.mxu1 %v1746_v50 }
  0x50   : > { %513 = vmatprep.subr.bf16.mxu0 %v1729_v45  ;;  %554 = vmatprep.subr.bf16.mxu1 %v1749_v51 }
  0x53   : > { %514 = vmatpush1.bf16.msra.mxu0 %v1733_v48  ;;  %555 = vmatpush1.bf16.msra.mxu1 %v1752_v54  ;;  %v600_v48 = vld [vmem:[%s2400_s2] sm:$0xff] (%p72_p13) }
  0x54   : > { %515 = vmatprep.subr.bf16.mxu0 %v1735_v49  ;;  %556 = vmatprep.subr.bf16.mxu1 %v1755_v55  ;;  %v2306_v49 = vand.u32 (%p72_p13), 127, %v151_v6  ;;  %601 = vst [vmem:[#allocation2] sm:$0xff] (%p72_p13), %v600_v48 }
  0x57   : > { %516 = vmatpush1.bf16.msra.mxu0 %v1739_v52  ;;  %557 = vmatpush1.bf16.msra.mxu1 %v1758_v58 }
  0x58   : > { %517 = vmatprep.subr.bf16.mxu0 %v1741_v53  ;;  %558 = vmatprep.subr.bf16.mxu1 %v1759_v59 }
  0x5b   : > { %518 = vmatpush1.bf16.msra.mxu0 %v1745_v56  ;;  %559 = vmatpush1.bf16.msra.mxu1 %v1761_v62 }
  0x5c   : > { %519 = vmatprep.subr.bf16.mxu0 %v1747_v57  ;;  %560 = vmatprep.subr.bf16.mxu1 %v1762_v63 }
  0x5f   : > { %520 = vmatpush1.bf16.msra.mxu0 %v1751_v60  ;;  %561 = vmatpush1.bf16.msra.mxu1 %v1764_v2 }
  0x60   : > { %521 = vmatprep.subr.bf16.mxu0 %v1753_v61  ;;  %562 = vmatprep.subr.bf16.mxu1 %v1765_v3 }
  0x63   : > { %522 = vmatpush1.bf16.msra.mxu0 %v1757_v1  ;;  %563 = vmatpush1.bf16.msra.mxu1 %v1767_v5 }
  0x66   : > { %524 = vmatmul.mubr.bf16.vlgmr.msra.gmra.mrb[0].mxu0 %v83_v4  ;;  %565 = vmatmul.mubr.bf16.vlgmr.msra.gmra.mrb[0].mxu1 %v83_v4 }
 0x139   : > { %v525_v14 = vpop.f32.mrb[0].mxu0  ;;  %v566_v24 = vpop.f32.mrb[0].mxu1 }
 0x13a   : > { %v526_v15 = vadd.f32 %v525_v14, %v154_v11  ;;  %v527_v16 = vpop.f32.mrb[1].mxu0  ;;  %v568_v25 = vpop.f32.mrb[1].mxu1  ;;  %v567_v31 = vadd.f32 %v566_v24, %v162_v28 }
 0x13b   : > { %v528_v17 = vadd.f32 %v527_v16, %v158_v12  ;;  %v529_v18 = vpop.f32.mrb[2].mxu0  ;;  %v569_v26 = vadd.f32 %v568_v25, %v166_v21  ;;  %v570_v27 = vpop.f32.mrb[2].mxu1 }
 0x13c   : > { %v1489_v19 = vmul.f32 -1.442695, %v526_v15  ;;  %v530_v20 = vpop.f32.mrb[3].mxu0  ;;  %v571_v29 = vpop.f32.mrb[3].mxu1 }
 0x13d   : > { %v1490_v22 = vmul.f32 -1.442695, %v528_v17  ;;  %v1491_v30 = vmul.f32 -1.442695, %v569_v26 }
 0x13e   : > { %1768 = vpow2.f32 %v1489_v19 }
 0x13f   : > { %1770 = vpow2.f32 %v1490_v22 }
 0x140   : > { %1772 = vpow2.f32 %v1491_v30 }
 0x141   : > { %1774 = vtanh.f32 %v567_v31 }
 0x148   : > { %v1769_v32 = vpop.eup %1768 }
 0x149   : > { %v1771_v33 = vpop.eup %1770  ;;  %v576_v34 = vadd.f32 1.0, %v1769_v32 }
 0x14a   : > { %v582_v35 = vadd.f32 1.0, %v1771_v33  ;;  %v1773_v36 = vpop.eup %1772 }
 0x14b   : > { %1776 = vrcp.f32 %v576_v34  ;;  %v1775_v37 = vpop.eup %1774  ;;  %v589_v40 = vadd.f32 1.0, %v1773_v36 }
 0x14c   : > { %1778 = vrcp.f32 %v582_v35 }
 0x14d   : > { %1780 = vrcp.f32 %v589_v40 }
 0x155   : > { %v1777_v39 = vpop.eup %1776 }
 0x156   : > { %v1779_v41 = vpop.eup %1778  ;;  %v593_v42 = vmul.f32 %v1777_v39, %v1775_v37 }
 0x157   : > { %v592_v43 = vmul.f32 %v1779_v41, %v82_v38  ;;  %v1781_v45 = vpop.eup %1780 }
 0x159   : > { %v594_v44 = vadd.f32 %v593_v42, %v592_v43 }
 0x15b   : > { %1782 = vtanh.f32 %v594_v44  ;;  %598 = vst [vmem:[#allocation3] sm:$0xff] %v594_v44 }
 0x162   :  { %74 = sbr.rel (!%p72_p13) target bundleno = 37 (0x25), region = 101 }
 0x165   : > { %v1783_v46 = vpop.eup %1782 }
 0x166   : > { %v596_v47 = vmul.f32 %v1783_v46, %v1781_v45 }
 0x168   : > { %597 = vst [vmem:[#allocation2 + $0x8] sm:$0xff] %v596_v47 }
 0x169 LB: > { %v1784_v50 = vld [vmem:[#allocation8 + $0x4] ss:$16 sps:$4 sm:$0xff]   ;;  %v1786_v51 = vld [vmem:[#allocation8] ss:$16 sps:$4 sm:$0xff]   ;;  %v1795_v54 = vld [vmem:[#allocation8 + $0xc] ss:$16 sps:$4 sm:$0xff]   ;;  %s1988_s12 = sphi %s2308_s12, %s609_s12  }
 0x16a   : > { %1021 = vmatprep.subr.bf16.mxu0 %v1784_v50  ;;  %v1787_v52 = vld [vmem:[#allocation8 + $0x24] ss:$16 sps:$4 sm:$0xff]   ;;  %v1789_v0 = vld [vmem:[#allocation8 + $0x20] ss:$16 sps:$4 sm:$0xff]   ;;  %v1798_v55 = vld [vmem:[#allocation8 + $0x8] ss:$16 sps:$4 sm:$0xff]   ;;  %1062 = vmatprep.subr.bf16.mxu1 %v1795_v54 }
 0x16b   : > { %1022 = vmatpush1.bf16.msra.mxu0 %v1786_v51  ;;  %v1790_v53 = vld [vmem:[#allocation8 + $0x44] ss:$16 sps:$4 sm:$0xff]   ;;  %v1792_v56 = vld [vmem:[#allocation8 + $0x40] ss:$16 sps:$4 sm:$0xff]   ;;  %1063 = vmatpush1.bf16.msra.mxu1 %v1798_v55  ;;  %v1801_v58 = vld [vmem:[#allocation8 + $0x2c] ss:$16 sps:$4 sm:$0xff]  }
 0x16c   : > { %1023 = vmatprep.subr.bf16.mxu0 %v1787_v52  ;;  %v1793_v57 = vld [vmem:[#allocation8 + $0x64] ss:$16 sps:$4 sm:$0xff]   ;;  %v1804_v59 = vld [vmem:[#allocation8 + $0x28] ss:$16 sps:$4 sm:$0xff]   ;;  %1064 = vmatprep.subr.bf16.mxu1 %v1801_v58  ;;  %v1797_v60 = vld [vmem:[#allocation8 + $0x60] ss:$16 sps:$4 sm:$0xff]  }
 0x16d   : > { %v1799_v61 = vld [vmem:[#allocation8 + $0x84] ss:$16 sps:$4 sm:$0xff]   ;;  %v1807_v62 = vld [vmem:[#allocation8 + $0x4c] ss:$16 sps:$4 sm:$0xff]   ;;  %v1810_v63 = vld [vmem:[#allocation8 + $0x48] ss:$16 sps:$4 sm:$0xff]  }
 0x16e   : > { %v1813_v1 = vld [vmem:[#allocation8 + $0x6c] ss:$16 sps:$4 sm:$0xff]   ;;  %v1803_v2 = vld [vmem:[#allocation8 + $0x80] ss:$16 sps:$4 sm:$0xff]   ;;  %v1805_v3 = vld [vmem:[#allocation8 + $0xa4] ss:$16 sps:$4 sm:$0xff]  }
 0x16f   : > { %1024 = vmatpush1.bf16.msra.mxu0 %v1789_v0  ;;  %1065 = vmatpush1.bf16.msra.mxu1 %v1804_v59  ;;  %v1816_v4 = vld [vmem:[#allocation8 + $0x68] ss:$16 sps:$4 sm:$0xff]   ;;  %v1819_v5 = vld [vmem:[#allocation8 + $0x8c] ss:$16 sps:$4 sm:$0xff]   ;;  %v1809_v6 = vld [vmem:[#allocation8 + $0xa0] ss:$16 sps:$4 sm:$0xff]  }
 0x170   : > { %1025 = vmatprep.subr.bf16.mxu0 %v1790_v53  ;;  %1066 = vmatprep.subr.bf16.mxu1 %v1807_v62  ;;  %v1811_v9 = vld [vmem:[#allocation8 + $0xc4] ss:$16 sps:$4 sm:$0xff]   ;;  %v1822_v11 = vld [vmem:[#allocation8 + $0x88] ss:$16 sps:$4 sm:$0xff]   ;;  %v1825_v12 = vld [vmem:[#allocation8 + $0xac] ss:$16 sps:$4 sm:$0xff]  }
 0x171   : > { %v1815_v14 = vld [vmem:[#allocation8 + $0xc0] ss:$16 sps:$4 sm:$0xff]   ;;  %v1817_v15 = vld [vmem:[#allocation8 + $0xe4] ss:$16 sps:$4 sm:$0xff]   ;;  %v1828_v16 = vld [vmem:[#allocation8 + $0xa8] ss:$16 sps:$4 sm:$0xff]  }
 0x172   : > { %v1831_v17 = vld [vmem:[#allocation8 + $0xcc] ss:$16 sps:$4 sm:$0xff]   ;;  %v1821_v18 = vld [vmem:[#allocation8 + $0xe0] ss:$16 sps:$4 sm:$0xff]   ;;  %v1823_v19 = vld [vmem:[#allocation8 + $0x104] ss:$16 sps:$4 sm:$0xff]  }
 0x173   : > { %1026 = vmatpush1.bf16.msra.mxu0 %v1792_v56  ;;  %1067 = vmatpush1.bf16.msra.mxu1 %v1810_v63  ;;  %v1834_v20 = vld [vmem:[#allocation8 + $0xc8] ss:$16 sps:$4 sm:$0xff]   ;;  %v1837_v21 = vld [vmem:[#allocation8 + $0xec] ss:$16 sps:$4 sm:$0xff]   ;;  %v1827_v22 = vld [vmem:[#allocation8 + $0x100] ss:$16 sps:$4 sm:$0xff]  }
 0x174   : > { %1027 = vmatprep.subr.bf16.mxu0 %v1793_v57  ;;  %1068 = vmatprep.subr.bf16.mxu1 %v1813_v1  ;;  %v1829_v24 = vld [vmem:[#allocation8 + $0x124] ss:$16 sps:$4 sm:$0xff]   ;;  %v1840_v25 = vld [vmem:[#allocation8 + $0xe8] ss:$16 sps:$4 sm:$0xff]   ;;  %v1843_v26 = vld [vmem:[#allocation8 + $0x10c] ss:$16 sps:$4 sm:$0xff]  }
 0x175   : > { %v1833_v27 = vld [vmem:[#allocation8 + $0x120] ss:$16 sps:$4 sm:$0xff]   ;;  %v1835_v28 = vld [vmem:[#allocation8 + $0x144] ss:$16 sps:$4 sm:$0xff]   ;;  %v1846_v29 = vld [vmem:[#allocation8 + $0x108] ss:$16 sps:$4 sm:$0xff]  }
 0x176   : > { %v1849_v30 = vld [vmem:[#allocation8 + $0x12c] ss:$16 sps:$4 sm:$0xff]   ;;  %v611_v31 = vld [vmem:[#allocation2 + $0x8] sm:$0xff]  ;;  %v1852_v35 = vld [vmem:[#allocation8 + $0x128] ss:$16 sps:$4 sm:$0xff]   ;;  %vm1996_vm0 = vmmov 0  }
 0x177   : > { %1028 = vmatpush1.bf16.msra.mxu0 %v1797_v60  ;;  %1069 = vmatpush1.bf16.msra.mxu1 %v1816_v4  ;;  %v1839_v32 = vld [vmem:[#allocation8 + $0x140] ss:$16 sps:$4 sm:$0xff]   ;;  %v614_v33 = vpack.c.bf16 %v611_v31, %v611_v31  ;;  %v1841_v34 = vld [vmem:[#allocation8 + $0x164] ss:$16 sps:$4 sm:$0xff]   ;;  %v1855_v37 = vld [vmem:[#allocation8 + $0x14c] ss:$16 sps:$4 sm:$0xff]  }
 0x178   : > { %1029 = vmatprep.subr.bf16.mxu0 %v1799_v61  ;;  %1070 = vmatprep.subr.bf16.mxu1 %v1819_v5  ;;  %v1845_v36 = vld [vmem:[#allocation8 + $0x160] ss:$16 sps:$4 sm:$0xff]   ;;  %v1847_v38 = vld [vmem:[#allocation8 + $0x184] ss:$16 sps:$4 sm:$0xff]   ;;  %v1858_v39 = vld [vmem:[#allocation8 + $0x148] ss:$16 sps:$4 sm:$0xff]  }
 0x179   : > { %1053 = vmatprep.mubr.bf16.mxu0 %v614_v33  ;;  %1094 = vmatprep.mubr.bf16.mxu1 %v614_v33  ;;  %v1861_v40 = vld [vmem:[#allocation8 + $0x16c] ss:$16 sps:$4 sm:$0xff]   ;;  %v1851_v41 = vld [vmem:[#allocation8 + $0x180] ss:$16 sps:$4 sm:$0xff]   ;;  %v1853_v42 = vld [vmem:[#allocation8 + $0x1a4] ss:$16 sps:$4 sm:$0xff]  }
 0x17a   : > { %v1864_v43 = vld [vmem:[#allocation8 + $0x168] ss:$16 sps:$4 sm:$0xff]   ;;  %v1867_v44 = vld [vmem:[#allocation8 + $0x18c] ss:$16 sps:$4 sm:$0xff]   ;;  %v1857_v45 = vld [vmem:[#allocation8 + $0x1a0] ss:$16 sps:$4 sm:$0xff]  }
 0x17b   : > { %1030 = vmatpush1.bf16.msra.mxu0 %v1803_v2  ;;  %1071 = vmatpush1.bf16.msra.mxu1 %v1822_v11  ;;  %v1859_v46 = vld [vmem:[#allocation8 + $0x1c4] ss:$16 sps:$4 sm:$0xff]   ;;  %v1870_v47 = vld [vmem:[#allocation8 + $0x188] ss:$16 sps:$4 sm:$0xff]   ;;  %v1871_v48 = vld [vmem:[#allocation8 + $0x1ac] ss:$16 sps:$4 sm:$0xff]  }
 0x17c   : > { %1031 = vmatprep.subr.bf16.mxu0 %v1805_v3  ;;  %1072 = vmatprep.subr.bf16.mxu1 %v1825_v12  ;;  %v1863_v50 = vld [vmem:[#allocation8 + $0x1c0] ss:$16 sps:$4 sm:$0xff]   ;;  %v1865_v51 = vld [vmem:[#allocation8 + $0x1e4] ss:$16 sps:$4 sm:$0xff]   ;;  %v1873_v52 = vld [vmem:[#allocation8 + $0x1a8] ss:$16 sps:$4 sm:$0xff]  }
 0x17d   : > { %v1874_v0 = vld [vmem:[#allocation8 + $0x1cc] ss:$16 sps:$4 sm:$0xff]   ;;  %v1869_v53 = vld [vmem:[#allocation8 + $0x1e0] ss:$16 sps:$4 sm:$0xff]   ;;  %v1876_v55 = vld [vmem:[#allocation8 + $0x1c8] ss:$16 sps:$4 sm:$0xff]  }
 0x17e   : > { %v610_v54 = vld [vmem:[#allocation2] sm:$0xff]  ;;  %v1995_v60 = vmov 0.0   ;;  %v1881_v61 = vld [vmem:[%s2406_s8 + $0x8] sm:$0xff]   ;;  %v1882_v62 = vld [vmem:[%s2406_s8 + $0x10] sm:$0xff]   ;;  %s1568_s26 = sshll.u32 %s1988_s12, 3  ;;  %p1570_p0 = scmp.ge.s32.totalorder %s1988_s12, 5 }
 0x17f   : > { %1032 = vmatpush1.bf16.msra.mxu0 %v1809_v6  ;;  %1073 = vmatpush1.bf16.msra.mxu1 %v1828_v16  ;;  %v1877_v56 = vld [vmem:[#allocation8 + $0x1ec] ss:$16 sps:$4 sm:$0xff]   ;;  %v613_v57 = vpack.c.bf16 %v610_v54, %v610_v54  ;;  %v1879_v58 = vld [vmem:[#allocation8 + $0x1e8] ss:$16 sps:$4 sm:$0xff]   ;;  %v1883_v63 = vld [vmem:[%s2406_s8 + $0x18] sm:$0xff]   ;;  %s1410_s0 = scalar_lea.vmem [#allocation9], %s1568_s26 }
 0x180   : > { %1033 = vmatprep.subr.bf16.mxu0 %v1811_v9  ;;  %1074 = vmatprep.subr.bf16.mxu1 %v1831_v17  ;;  %v1880_v59 = vld [vmem:[%s2406_s8] sm:$0xff]   ;;  %v1885_v2 = vld [vmem:[%s2406_s8 + $0x28] sm:$0xff]   ;;  %v1886_v3 = vld [vmem:[%s2406_s8 + $0x30] sm:$0xff]   ;;  %s1249_s29 = sld [smem:[#allocation4 + %s1988_s12]] (!%p1570_p0) }
 0x181   : > { %v1884_v1 = vld [vmem:[%s2406_s8 + $0x20] sm:$0xff]   ;;  %v1887_v4 = vld [vmem:[%s2406_s8 + $0x38] sm:$0xff]  }
 0x182   : > { %v679_v5 = vld [vmem:[%s2405_s7] sm:$0xf] }
 0x183   : > { %1034 = vmatpush1.bf16.msra.mxu0 %v1815_v14  ;;  %1075 = vmatpush1.bf16.msra.mxu1 %v1834_v20  ;;  %v684_v6 = vrot.slane %v679_v5, %v153_v8  ;;  %v688_v9 = vrot.slane %v679_v5, %v157_v10 }
 0x184   : > { %1035 = vmatprep.subr.bf16.mxu0 %v1817_v15  ;;  %1076 = vmatprep.subr.bf16.mxu1 %v1837_v21 }
 0x186   : > { %p1571_p1 = scmp.eq.s32.totalorder (!%p1570_p0), %s1249_s29, 0 }
 0x187   : > { %1036 = vmatpush1.bf16.msra.mxu0 %v1821_v18  ;;  %1077 = vmatpush1.bf16.msra.mxu1 %v1840_v25 }
 0x188   : > { %1037 = vmatprep.subr.bf16.mxu0 %v1823_v19  ;;  %1078 = vmatprep.subr.bf16.mxu1 %v1843_v26  ;;  %v696_v19 = vrot.slane %v679_v5, %v165_v13  ;;  %v692_v26 = vrot.slane %v679_v5, %v161_v23 }
 0x18b   : > { %1038 = vmatpush1.bf16.msra.mxu0 %v1827_v22  ;;  %1079 = vmatpush1.bf16.msra.mxu1 %v1846_v29 }
 0x18c   : > { %1039 = vmatprep.subr.bf16.mxu0 %v1829_v24  ;;  %1080 = vmatprep.subr.bf16.mxu1 %v1849_v30 }
 0x18f   : > { %1040 = vmatpush1.bf16.msra.mxu0 %v1833_v27  ;;  %1081 = vmatpush1.bf16.msra.mxu1 %v1852_v35 }
 0x190   : > { %1041 = vmatprep.subr.bf16.mxu0 %v1835_v28  ;;  %1082 = vmatprep.subr.bf16.mxu1 %v1855_v37 }
 0x193   : > { %1042 = vmatpush1.bf16.msra.mxu0 %v1839_v32  ;;  %1083 = vmatpush1.bf16.msra.mxu1 %v1858_v39 }
 0x194   : > { %1043 = vmatprep.subr.bf16.mxu0 %v1841_v34  ;;  %1084 = vmatprep.subr.bf16.mxu1 %v1861_v40 }
 0x197   : > { %1044 = vmatpush1.bf16.msra.mxu0 %v1845_v36  ;;  %1085 = vmatpush1.bf16.msra.mxu1 %v1864_v43  ;;  %v612_v36 = vld [vmem:[#allocation3] sm:$0xff] }
 0x198   : > { %1045 = vmatprep.subr.bf16.mxu0 %v1847_v38  ;;  %1086 = vmatprep.subr.bf16.mxu1 %v1867_v44 }
 0x19b   : > { %1046 = vmatpush1.bf16.msra.mxu0 %v1851_v41  ;;  %1087 = vmatpush1.bf16.msra.mxu1 %v1870_v47  ;;  %v1559_v47 = vld [vmem:[%s2407_s9] ss:$0 sm:$0xff] }
 0x19c   : > { %1047 = vmatprep.subr.bf16.mxu0 %v1853_v42  ;;  %1088 = vmatprep.subr.bf16.mxu1 %v1871_v48 }
 0x19f   : > { %1048 = vmatpush1.bf16.msra.mxu0 %v1857_v45  ;;  %1089 = vmatpush1.bf16.msra.mxu1 %v1873_v52 }
 0x1a0   : > { %1049 = vmatprep.subr.bf16.mxu0 %v1859_v46  ;;  %1090 = vmatprep.subr.bf16.mxu1 %v1874_v0 }
 0x1a3   : > { %1050 = vmatpush1.bf16.msra.mxu0 %v1863_v50  ;;  %1091 = vmatpush1.bf16.msra.mxu1 %v1876_v55 }
 0x1a4   : > { %1051 = vmatprep.subr.bf16.mxu0 %v1865_v51  ;;  %1092 = vmatprep.subr.bf16.mxu1 %v1877_v56 }
 0x1a7   : > { %1052 = vmatpush1.bf16.msra.mxu0 %v1869_v53  ;;  %1093 = vmatpush1.bf16.msra.mxu1 %v1879_v58 }
 0x1a8   : > { %1603 = vmatprep.subr.bf16.mxu0 %v1995_v60 }
 0x1aa   : > { %1054 = vmatmul.mubr.bf16.vlgmr.msra.gmra.mrb[0].mxu0 %v613_v57  ;;  %1095 = vmatmul.mubr.bf16.vlgmr.msra.gmra.mrb[0].mxu1 %v613_v57 }
 0x1ab   : > { %1604 = vmatpush3.bf16.msra.mxu0 %v1880_v59  ;;  %1619 = vmatprep.mubr.msk.bf16.mxu0 %vm1996_vm0, %v1995_v60 }
 0x1ac   : > { %1605 = vmatprep.subr.bf16.mxu0 %v1995_v60 }
 0x1af   : > { %1606 = vmatpush3.bf16.msra.mxu0 %v1881_v61 }
 0x1b0   : > { %1607 = vmatprep.subr.bf16.mxu0 %v1995_v60 }
 0x1b3   : > { %1608 = vmatpush3.bf16.msra.mxu0 %v1882_v62 }
 0x1b4   : > { %1609 = vmatprep.subr.bf16.mxu0 %v1995_v60 }
 0x1b7   : > { %1610 = vmatpush3.bf16.msra.mxu0 %v1883_v63 }
 0x1b8   : > { %1611 = vmatprep.subr.bf16.mxu0 %v1995_v60 }
 0x1bb   : > { %1612 = vmatpush3.bf16.msra.mxu0 %v1884_v1 }
 0x1bc   : > { %1613 = vmatprep.subr.bf16.mxu0 %v1995_v60 }
 0x1bf   : > { %1614 = vmatpush3.bf16.msra.mxu0 %v1885_v2 }
 0x1c0   : > { %1615 = vmatprep.subr.bf16.mxu0 %v1995_v60 }
 0x1c3   : > { %1616 = vmatpush3.bf16.msra.mxu0 %v1886_v3 }
 0x1c4   : > { %1617 = vmatprep.subr.bf16.mxu0 %v1995_v60 }
 0x1c7   : > { %1618 = vmatpush3.bf16.msra.mxu0 %v1887_v4 }
 0x27d   : > { %v1055_v11 = vpop.f32.mrb[0].mxu0  ;;  %v1096_v21 = vpop.f32.mrb[0].mxu1 }
 0x27e   : > { %v1056_v12 = vadd.f32 %v1055_v11, %v684_v6  ;;  %v1057_v14 = vpop.f32.mrb[1].mxu0  ;;  %v1098_v22 = vpop.f32.mrb[1].mxu1  ;;  %v1097_v29 = vadd.f32 %v1096_v21, %v692_v26 }
 0x27f   : > { %v1058_v15 = vadd.f32 %v1057_v14, %v688_v9  ;;  %v1059_v16 = vpop.f32.mrb[2].mxu0  ;;  %v1099_v24 = vadd.f32 %v1098_v22, %v696_v19  ;;  %v1100_v25 = vpop.f32.mrb[2].mxu1 }
 0x280   : > { %v1556_v17 = vmul.f32 -1.442695, %v1056_v12  ;;  %v1060_v18 = vpop.f32.mrb[3].mxu0  ;;  %v1101_v27 = vpop.f32.mrb[3].mxu1 }
 0x281   : > { %v1557_v20 = vmul.f32 -1.442695, %v1058_v15  ;;  %v1558_v28 = vmul.f32 -1.442695, %v1099_v24 }
 0x282   : > { %1888 = vpow2.f32 %v1556_v17 }
 0x283   : > { %1890 = vpow2.f32 %v1557_v20 }
 0x284   : > { %1892 = vpow2.f32 %v1558_v28 }
 0x285   : > { %1894 = vtanh.f32 %v1097_v29 }
 0x28c   : > { %v1889_v30 = vpop.eup %1888 }
 0x28d   : > { %v1891_v31 = vpop.eup %1890  ;;  %v1106_v32 = vadd.f32 1.0, %v1889_v30 }
 0x28e   : > { %v1112_v33 = vadd.f32 1.0, %v1891_v31  ;;  %v1893_v34 = vpop.eup %1892 }
 0x28f   : > { %1896 = vrcp.f32 %v1106_v32  ;;  %v1895_v35 = vpop.eup %1894  ;;  %v1119_v38 = vadd.f32 1.0, %v1893_v34 }
 0x290   : > { %1898 = vrcp.f32 %v1112_v33 }
 0x291   : > { %1900 = vrcp.f32 %v1119_v38 }
 0x299   : > { %v1897_v37 = vpop.eup %1896 }
 0x29a   : > { %v1899_v39 = vpop.eup %1898  ;;  %v1123_v40 = vmul.f32 %v1897_v37, %v1895_v35 }
 0x29b   : > { %v1122_v41 = vmul.f32 %v1899_v39, %v612_v36  ;;  %v1901_v43 = vpop.eup %1900 }
 0x29d   : > { %v1124_v42 = vadd.f32 %v1123_v40, %v1122_v41 }
 0x29f   : > { %1902 = vtanh.f32 %v1124_v42  ;;  %1128 = vst [vmem:[#allocation3] sm:$0xff] %v1124_v42 }
 0x2a9   : > { %v1903_v44 = vpop.eup %1902 }
 0x2aa   : > { %v1126_v45 = vmul.f32 %v1903_v44, %v1901_v43 }
 0x2ac   : > { %1127 = vst [vmem:[#allocation2 + $0x8] sm:$0xff] %v1126_v45  ;;  %v1129_v46 = vpack.c.bf16 %v1126_v45, %v1126_v45 }
 0x2ae   : > { %1620 = vmatmul.mubr.bf16.vlgmr.msra.gmra.mrb[4].mxu0 %v1129_v46 }
 0x37e   : > { %1248 = sbr.rel (%p1570_p0) target bundleno = 1564 (0x61c), region = 71 }
 0x381   : > { %v1235_v48 = vpop.f32.mrb[4].mxu0 }
 0x382   : > { %v1236_v50 = vadd.f32 %v1559_v47, %v1235_v48  ;;  %v1621_v51 = vpop.f32.mrb[5].mxu0 }
 0x383   : > { %v1238_v52 = vpop.f32.mrb[6].mxu0 }
 0x384   : > { %1569 = vst [vmem:[%s1410_s0 + $0x8] sm:$0xff] %v1236_v50  ;;  %v1622_v0 = vpop.f32.mrb[7].mxu0 }
 0x385   : > { %1253 = sbr.rel (%p1571_p1) target bundleno = 908 (0x38c), region = 75  ;;  %s1255_s2 = scalar_lea.vmem (!%p1571_p1), %s2401_s3, %s1568_s26 }
 0x386   : > { %v1256_v53 = vld [vmem:[%s1255_s2] sm:$0xff] (!%p1571_p1) }
 0x387   : > { %1257 = vst [vmem:[#allocation2] sm:$0xff] (!%p1571_p1), %v1256_v53 }
 0x38c PF: > { %p1573_p2 = scmp.ne.s32.totalorder %s1249_s29, 0 }
 0x38d   : > { %1262 = vmax.xlane.f32.xlu0 (!%p1573_p2), %v1236_v50  ;;  %v1904_v58 = vld [vmem:[%s2408_s10] sm:$0xff] (!%p1573_p2)   ;;  %v1997_v59 = vmov (!%p1573_p2), 0.0   ;;  %v1905_v60 = vld [vmem:[%s2408_s10 + $0x8] sm:$0xff] (!%p1573_p2)   ;;  %v1906_v61 = vld [vmem:[%s2408_s10 + $0x10] sm:$0xff] (!%p1573_p2)   ;;  %vm1998_vm3 = vmmov (!%p1573_p2), 0  }
 0x38e   : > { %1261 = sbr.rel (%p1573_p2) target bundleno = 1564 (0x61c), region = 79  ;;  %1623 = vmatprep.subr.bf16.mxu0 (!%p1573_p2), %v1997_v59  ;;  %v1907_v62 = vld [vmem:[%s2408_s10 + $0x18] sm:$0xff] (!%p1573_p2)   ;;  %v1908_v63 = vld [vmem:[%s2408_s10 + $0x20] sm:$0xff] (!%p1573_p2)   ;;  %v1909_v1 = vld [vmem:[%s2408_s10 + $0x28] sm:$0xff] (!%p1573_p2)   ;;  %1639 = vmatprep.mubr.msk.bf16.mxu0 (!%p1573_p2), %vm1998_vm3, %v1997_v59  ;;  %v1999_v17 = vmov (!%p1573_p2), 1.0|1.0  }
 0x38f   : > { %1624 = vmatpush3.bf16.msra.mxu0 (!%p1573_p2), %v1904_v58  ;;  %v1910_v6 = vld [vmem:[%s2408_s10 + $0x30] sm:$0xff] (!%p1573_p2)   ;;  %v1911_v9 = vld [vmem:[%s2408_s10 + $0x38] sm:$0xff] (!%p1573_p2)  }
 0x390   : > { %1625 = vmatprep.subr.bf16.mxu0 (!%p1573_p2), %v1997_v59 }
 0x393   : > { %1626 = vmatpush3.bf16.msra.mxu0 (!%p1573_p2), %v1905_v60 }
 0x394   : > { %1627 = vmatprep.subr.bf16.mxu0 (!%p1573_p2), %v1997_v59 }
 0x397   : > { %1628 = vmatpush3.bf16.msra.mxu0 %v1906_v61 }
 0x398   : > { %1629 = vmatprep.subr.bf16.mxu0 %v1997_v59 }
 0x39b   : > { %1630 = vmatpush3.bf16.msra.mxu0 %v1907_v62 }
 0x39c   : > { %1631 = vmatprep.subr.bf16.mxu0 %v1997_v59 }
 0x39f   : > { %1632 = vmatpush3.bf16.msra.mxu0 %v1908_v63 }
 0x3a0   : > { %1633 = vmatprep.subr.bf16.mxu0 %v1997_v59 }
 0x3a3   : > { %1634 = vmatpush3.bf16.msra.mxu0 %v1909_v1 }
 0x3a4   : > { %1635 = vmatprep.subr.bf16.mxu0 %v1997_v59 }
 0x3a7   : > { %1636 = vmatpush3.bf16.msra.mxu0 %v1910_v6 }
 0x3a8   : > { %1637 = vmatprep.subr.bf16.mxu0 %v1997_v59 }
 0x3ab   : > { %1638 = vmatpush3.bf16.msra.mxu0 %v1911_v9 }
 0x41a   : > { %v1263_v54 = vpop.xlane.xlu0 %1262 }
 0x41b   : > { %vm1264_vm1 = vcmp.eq.f32.partialorder %v1236_v50, %v1263_v54 }
 0x41c   : > { %v1265_v55 = vsel %vm1264_vm1, %v2306_v49, 128 }
 0x41d   : > { %v1267_v56 = vshra.s32 %v1265_v55, 16  ;;  %v1266_v2 = vand.u32 65535, %v1265_v55 }
 0x41f   : > { %v1269_v57 = vcvt.s32.f32 %v1267_v56  ;;  %v1268_v4 = vcvt.s32.f32 %v1266_v2 }
 0x421   : > { %1270 = vmin.xlane.f32.xlu0 %v1269_v57 }
 0x4ae   : > { %v1271_v3 = vpop.xlane.xlu0 %1270 }
 0x4af   : > { %vm1272_vm2 = vcmp.eq.f32.partialorder %v1269_v57, %v1271_v3  ;;  %v1277_v11 = vcvt.f32.s32 %v1271_v3 }
 0x4b0   : > { %v1273_v5 = vsel %vm1272_vm2, %v1268_v4, inf }
 0x4b1   : > { %1274 = vmin.xlane.f32.xlu1 %v1273_v5  ;;  %v1278_v14 = vshll.u32 %v1277_v11, 16 }
 0x53e   : > { %v1275_v12 = vpop.xlane.xlu1 %1274 }
 0x53f   : > { %v1276_v15 = vcvt.f32.s32 %v1275_v12 }
 0x541   : > { %v1279_v16 = vadd.s32 %v1278_v14, %v1276_v15 }
 0x543   : > { %vm1280_vm4 = vcmp.eq.s32.totalorder %v2306_v49, %v1279_v16 }
 0x544   : > { %vm1583_vm5 = vmpackc.low %vm1280_vm4, %vm1280_vm4 }
 0x545   : > { %1640 = vmatmul.mubr.msk.bf16.vlgmr.msra.gmra.mrb[0].mxu0 %vm1583_vm5, %v1999_v17 }
 0x618   : > { %v1382_v18 = vpop.f32.mrb[0].mxu0 }
 0x619   : > { %1388 = vst [vmem:[#allocation2] sm:$0xff] %v1382_v18  ;;  %v1641_v19 = vpop.f32.mrb[1].mxu0 }
 0x61a   : > { %v1385_v20 = vpop.f32.mrb[2].mxu0 }
 0x61b   : > { %v1642_v21 = vpop.f32.mrb[3].mxu0 }
 0x61c PF: > { %s609_s12 = sadd.s32 1, %s1988_s12  }
 0x61d   : > { %p606_p3 = scmp.ge.s32.totalorder %s609_s12, 6  }
 0x61e   :  { %s2000_s26 = smov (%p606_p3), [#allocation9]  }
 0x61f   :  { %608 = sbr.rel (!%p606_p3) target bundleno = 361 (0x169), region = 112  ;;  %s1394_s27 = sshll.u32 (%p606_p3), %s2000_s26, 4  ;;  %s1395_s27 = int_to_ptr.vmem [resolvable:$true] %s1394_s27 }
 0x620   :  { %s1946_s28 = scalar_lea.vmem (%p606_p3), %s1395_s27, 896  ;;  %p1951_p5 = scmp.lt.s32.totalorder (%p606_p3), %s1395_s27, %s1395_s27 }
 0x621   :  { %p1947_p4 = scmp.ne.s32.totalorder (%p606_p3), %s1395_s27, %s1946_s28  ;;  %p1952_p6 = scmp.lt.s32.totalorder (%p606_p3), %s1946_s28, %s1946_s28 }
 0x623   :  { %p1953_p7 = por (%p606_p3), %p1952_p6, %p1951_p5 }
 0x625   :  { %p1954_p8 = pnand (%p606_p3), %p1953_p7, %p1947_p4 }
 0x627   :  { %1957 = shalt.err (!%p1954_p8)
}
 0x628   :  { %s1958_s30 = scalar_lea.hbm %s2409_s11, 896 }
 0x629   :  { %p1959_p9 = scmp.ne.s32.totalorder %s2409_s11, %s1958_s30  ;;  %p1962_p10 = scmp.lt.u32.totalorder %s1958_s30, %s2409_s11 }
 0x62b   :  { %p1964_p11 = pnand %p1962_p10, %p1959_p9 }
 0x62d   :  { %1967 = shalt.err (!%p1964_p11)
}
 0x62e   :  { %s2001_s3 = smov 128   ;;  %s2002_s7 = smov 8  }
 0x62f   :  { %1400 = dma.vmem_to_hbm [thread:$0]  %s1395_s27, 896, %s2409_s11, [#allocation6], %s2001_s3, %s2001_s3, %s2002_s7  }
 0x630   :  { %1980 = dma.done.wait [#allocation6], 896  }
 0x631   :  { %1981 = vsyncadd [#allocation6], 4294966400 }
 0x632   :  { %1404 = vsyncpa [#allocation5], 1 }
 0x633   :  { %1405 = vsyncpa [#allocation6], 1 }
 0x634   :  { %1406 = vsyncpa [#allocation7], 1 }

</bundles_post_ra>
